<compile_context>
chip_gen: v7x
topology: tpu7x:2x2x1
jax: 0.10.0
libtpu: 0.0.40
codegen_flags: <defaults>
</compile_context>

<pallas_src>
import jax
import jax.numpy as jnp
from jax.experimental import pallas as pl
from jax.experimental.pallas import tpu as pltpu


_VMEM_LIMIT_BYTES = 32 * 1024 * 1024  # safe on v5e (16 MiB default) .. v7x (64 MiB phys)


def _round_up(n, m):
    return ((n + m - 1) // m) * m


def _pick_tile(n, candidates):
    for c in candidates:
        if n % c == 0:
            return c
    return n


# ----------------------------------------------------------------------------
# Phase 1 kernel: per-row spatial sums of sp and co (one streaming pass).
# Grid = (row_tiles, hw_tiles); hw axis is the reduction ("arbitrary") axis and
# the (row_t, 1) f32 output blocks stay resident across it.
# ----------------------------------------------------------------------------
def _sum_kernel(sp_ref, co_ref, ssum_ref, csum_ref):
    @pl.when(pl.program_id(1) == 0)
    def _():
        ssum_ref[...] = jnp.zeros_like(ssum_ref)
        csum_ref[...] = jnp.zeros_like(csum_ref)

    ssum_ref[...] += jnp.sum(sp_ref[...].astype(jnp.float32), axis=-1, keepdims=True)
    csum_ref[...] += jnp.sum(co_ref[...].astype(jnp.float32), axis=-1, keepdims=True)


# ----------------------------------------------------------------------------
# Phase 2 kernel: lane-dense streaming fuse.
#   out = fuse_s * sp + fuse_c * co   (fuse_* already include the "+1")
# fs/fc are per-row f32 scalars broadcast along lanes; math in f32, output in
# the native feature-map dtype.
# ----------------------------------------------------------------------------
def _fuse_kernel(sp_ref, co_ref, fs_ref, fc_ref, out_ref):
    sp = sp_ref[...].astype(jnp.float32)
    co = co_ref[...].astype(jnp.float32)
    out = fs_ref[...] * sp + fc_ref[...] * co
    out_ref[...] = out.astype(out_ref.dtype)


# ----------------------------------------------------------------------------
# Wrapper: layout plumbing, BN folding, tiny attention math, two pallas_calls.
# ----------------------------------------------------------------------------
def afd_forward(sp_feat, co_feat, params, h=2):
    B, Cs, H, W = sp_feat.shape
    Cc = co_feat.shape[1]
    # The final broadcast add in the PyTorch module requires Cs == Cc.
    assert Cs == Cc, "AFD fuse requires s_channels == c_channels"
    HW = H * W
    dtype = sp_feat.dtype
    itemsize = jnp.dtype(dtype).itemsize
    eps = 1e-5
    scale = h ** (-0.5)

    # ---- flatten to (rows, HW) and pad to (mult-of-8, mult-of-128) ---------
    R = B * Cs
    R_pad = _round_up(R, 8)
    HW_pad = _round_up(HW, 128)

    sp = sp_feat.reshape(R, HW)
    co = co_feat.reshape(B * Cc, HW)
    if R_pad != R or HW_pad != HW:
        sp = jnp.pad(sp, ((0, R_pad - R), (0, HW_pad - HW)))
        co = jnp.pad(co, ((0, R_pad - R), (0, HW_pad - HW)))

    # Tile sizes: lane-dense (multiple of 128), capped so each f32 tile is
    # <= 2 MiB -> (2 in + 1 out) x 2 double-buffers ~= 12 MiB worst case.
    row_t = _pick_tile(R_pad, (256, 128, 64, 32, 16, 8))
    lane_t = _pick_tile(HW_pad, (2048, 1024, 512, 256, 128))
    grid = (R_pad // row_t, HW_pad // lane_t)

    # ---- Phase 1: per-(b, c) spatial sums -----------------------------------
    ssum, csum = pl.pallas_call(
        _sum_kernel,
        grid=grid,
        in_specs=[
            pl.BlockSpec((row_t, lane_t), lambda r, k: (r, k)),
            pl.BlockSpec((row_t, lane_t), lambda r, k: (r, k)),
        ],
        out_specs=(
            pl.BlockSpec((row_t, 1), lambda r, k: (r, 0)),
            pl.BlockSpec((row_t, 1), lambda r, k: (r, 0)),
        ),
        out_shape=(
            jax.ShapeDtypeStruct((R_pad, 1), jnp.float32),
            jax.ShapeDtypeStruct((R_pad, 1), jnp.float32),
        ),
        compiler_params=pltpu.CompilerParams(
            dimension_semantics=("parallel", "arbitrary"),
            vmem_limit_bytes=_VMEM_LIMIT_BYTES),
        cost_estimate=pl.CostEstimate(
            flops=2 * R_pad * HW_pad,
            transcendentals=0,
            bytes_accessed=2 * R_pad * HW_pad * itemsize + 2 * R_pad * 4),
    )(sp, co)

    # ---- Glue (XLA): tiny attention math in f32 -----------------------------
    s_mean = ssum[:R, 0].reshape(B, Cs) / HW            # padded lanes are zero
    c_mean = csum[:B * Cc, 0].reshape(B, Cc) / HW

    def fold_bn(gamma, beta, mean, var):
        s = gamma / jnp.sqrt(var + eps)
        return s, beta - mean * s

    s_bn_s, s_bn_b = fold_bn(*params["bn_s"])
    c_bn_s, c_bn_b = fold_bn(*params["bn_c"])

    # ChannelAtt: 1x1 conv on pooled vector == channel matmul, then BN + ReLU.
    s_att = jnp.maximum((s_mean @ params["ws"].T + params["bs"]) * s_bn_s + s_bn_b, 0.0)
    c_att = jnp.maximum((c_mean @ params["wc"].T + params["bc"]) * c_bn_s + c_bn_b, 0.0)

    d = Cs + Cc
    sc = jnp.concatenate([s_att, c_att], axis=-1)       # (B, d)
    qkv = sc @ params["w_qkv"].T                        # (B, 3d)
    q, k, v = qkv[:, :d], qkv[:, d:2 * d], qkv[:, 2 * d:]
    attn = jax.nn.softmax((q @ k.T) * scale, axis=-1)   # (B, B)
    fuse = attn @ v @ params["w_proj"].T + params["b_proj"]  # (B, d)
    # proj_drop (nn.Dropout(0.1)) is identity in eval mode.

    fuse_s = (1.0 + fuse[:, :Cs]).reshape(R, 1).astype(jnp.float32)
    fuse_c = (1.0 + fuse[:, d - Cc:]).reshape(B * Cc, 1).astype(jnp.float32)
    if R_pad != R:
        fuse_s = jnp.pad(fuse_s, ((0, R_pad - R), (0, 0)))
        fuse_c = jnp.pad(fuse_c, ((0, R_pad - R), (0, 0)))

    # ---- Phase 2: gridded lane-dense streaming fuse --------------------------
    out = pl.pallas_call(
        _fuse_kernel,
        grid=grid,
        in_specs=[
            pl.BlockSpec((row_t, lane_t), lambda r, k: (r, k)),
            pl.BlockSpec((row_t, lane_t), lambda r, k: (r, k)),
            pl.BlockSpec((row_t, 1), lambda r, k: (r, 0)),
            pl.BlockSpec((row_t, 1), lambda r, k: (r, 0)),
        ],
        out_specs=pl.BlockSpec((row_t, lane_t), lambda r, k: (r, k)),
        out_shape=jax.ShapeDtypeStruct((R_pad, HW_pad), dtype),
        compiler_params=pltpu.CompilerParams(
            dimension_semantics=("parallel", "parallel"),
            vmem_limit_bytes=_VMEM_LIMIT_BYTES),
        cost_estimate=pl.CostEstimate(
            flops=3 * R_pad * HW_pad,
            transcendentals=0,
            bytes_accessed=3 * R_pad * HW_pad * itemsize + 2 * R_pad * 4),
    )(sp, co, fuse_s, fuse_c)

    out = out[:R, :HW].reshape(B, Cs, H, W)

    # ChannelAtt returns its input untouched -> s_feat / c_feat are the inputs.
    return sp_feat, co_feat, out


# ----------------------------------------------------------------------------
# Pure-JAX reference (mirrors the PyTorch forward, eval mode) for verification.
# ----------------------------------------------------------------------------
def afd_ref(sp_feat, co_feat, params, h=2):
    B, Cs, H, W = sp_feat.shape
    Cc = co_feat.shape[1]
    d = Cs + Cc
    eps = 1e-5

    def chan_att(x, w, b, bn):
        g, bb, m, v = bn
        a = jnp.mean(x, axis=(2, 3))                    # (B, C)
        a = a @ w.T + b
        a = (a - m) / jnp.sqrt(v + eps) * g + bb        # BN (eval)
        return jnp.maximum(a, 0.0)                      # ReLU

    s_att = chan_att(sp_feat, params["ws"], params["bs"], params["bn_s"])
    c_att = chan_att(co_feat, params["wc"], params["bc"], params["bn_c"])
    sc = jnp.concatenate([s_att, c_att], axis=-1)
    qkv = (sc @ params["w_qkv"].T).reshape(B, 3, d)
    q, k, v = qkv[:, 0], qkv[:, 1], qkv[:, 2]
    attn = jax.nn.softmax((q @ k.T) * (h ** -0.5), axis=-1)
    fuse = attn @ v @ params["w_proj"].T + params["b_proj"]
    fuse_s = fuse[:, :Cs][:, :, None, None]
    fuse_c = fuse[:, -Cc:][:, :, None, None]
    out = (1.0 + fuse_s) * sp_feat + (1.0 + fuse_c) * co_feat
    return sp_feat, co_feat, out


if __name__ == "__main__":
    h = 2
    s_channels = c_channels = 4
    d = s_channels + c_channels

    key = jax.random.PRNGKey(0)
    ks = jax.random.split(key, 16)

    def bn_params(k, c):
        k1, k2, k3, k4 = jax.random.split(k, 4)
        gamma = 1.0 + 0.1 * jax.random.normal(k1, (c,), jnp.float32)
        beta = 0.1 * jax.random.normal(k2, (c,), jnp.float32)
        mean = 0.05 * jax.random.normal(k3, (c,), jnp.float32)
        var = 1.0 + 0.1 * jnp.abs(jax.random.normal(k4, (c,), jnp.float32))
        return (gamma, beta, mean, var)

    params = {
        "ws": 0.2 * jax.random.normal(ks[2], (s_channels, s_channels), jnp.float32),
        "bs": 0.1 * jax.random.normal(ks[3], (s_channels,), jnp.float32),
        "bn_s": bn_params(ks[4], s_channels),
        "wc": 0.2 * jax.random.normal(ks[5], (c_channels, c_channels), jnp.float32),
        "bc": 0.1 * jax.random.normal(ks[6], (c_channels,), jnp.float32),
        "bn_c": bn_params(ks[7], c_channels),
        "w_qkv": 0.2 * jax.random.normal(ks[8], (3 * d, d), jnp.float32),
        "w_proj": 0.2 * jax.random.normal(ks[9], (d, d), jnp.float32),
        "b_proj": 0.1 * jax.random.normal(ks[10], (d,), jnp.float32),
    }

    # --- main test: lane-aligned spatial size (16x16 -> HW=256) --------------
    B, H, W = 2, 16, 16
    sp_feat = jax.random.normal(ks[0], (B, s_channels, H, W), jnp.float32)
    co_feat = jax.random.normal(ks[1], (B, c_channels, H, W), jnp.float32)

    s_feat, c_feat, out = afd_forward(sp_feat, co_feat, params, h=h)
    jax.block_until_ready(out)

    _, _, out_ref = afd_ref(sp_feat, co_feat, params, h=h)
    assert jnp.allclose(out, out_ref, rtol=2e-2, atol=2e-2), "mismatch vs reference"
    assert jnp.array_equal(s_feat, sp_feat) and jnp.array_equal(c_feat, co_feat)

    # --- second test: non-128-multiple spatial size exercises the pad path ---
    H2 = W2 = 10
    sp2 = jax.random.normal(ks[11], (B, s_channels, H2, W2), jnp.float32)
    co2 = jax.random.normal(ks[12], (B, c_channels, H2, W2), jnp.float32)
    _, _, out2 = afd_forward(sp2, co2, params, h=h)
    jax.block_until_ready(out2)
    _, _, out2_ref = afd_ref(sp2, co2, params, h=h)
    assert jnp.allclose(out2, out2_ref, rtol=2e-2, atol=2e-2), "mismatch (padded path)"

    print("KERNEL_OK")
</pallas_src>

<mosaic_0001>
module attributes {stable_mosaic.version = 11 : i64} {
  func.func @_sum_kernel(%arg0: i32, %arg1: i32, %arg2: memref<8x256xf32, #tpu.memory_space<vmem>>, %arg3: memref<8x256xf32, #tpu.memory_space<vmem>>, %arg4: memref<8x1xf32, #tpu.memory_space<vmem>>, %arg5: memref<8x1xf32, #tpu.memory_space<vmem>>) attributes {dimension_semantics = [#tpu.dimension_semantics<parallel>, #tpu.dimension_semantics<arbitrary>], iteration_bounds = array<i64: 1, 1>, scalar_prefetch = 0 : i64, scratch_operands = 0 : i64, tpu.core_type = #tpu.core_type<tc>, window_params = [{transform_indices = @transform_0, window_bounds = array<i64: 8, 256>}, {transform_indices = @transform_1, window_bounds = array<i64: 8, 256>}, {transform_indices = @transform_2, window_bounds = array<i64: 8, 1>}, {transform_indices = @transform_3, window_bounds = array<i64: 8, 1>}]} {
    %c0_i32 = arith.constant 0 : i32
    %0 = arith.cmpi eq, %arg1, %c0_i32 : i32
    %1 = arith.extui %0 : i1 to i32
    %c0_i32_0 = arith.constant 0 : i32
    %2 = arith.cmpi ne, %1, %c0_i32_0 : i32
    scf.if %2 {
      %cst_13 = arith.constant 0.000000e+00 : f32
      %15 = vector.broadcast %cst_13 : f32 to vector<8x1xf32>
      %c0_14 = arith.constant 0 : index
      %c0_15 = arith.constant 0 : index
      %16 = vector.load %arg4[%c0_14, %c0_15] : memref<8x1xf32, #tpu.memory_space<vmem>>, vector<8x1xf32>
      tpu.vector_store %arg4[%c0_14, %c0_15], %15 {strides = array<i32>} : memref<8x1xf32, #tpu.memory_space<vmem>>, vector<8x1xf32>,
      %cst_16 = arith.constant 0.000000e+00 : f32
      %17 = vector.broadcast %cst_16 : f32 to vector<8x1xf32>
      %c0_17 = arith.constant 0 : index
      %c0_18 = arith.constant 0 : index
      %18 = vector.load %arg5[%c0_17, %c0_18] : memref<8x1xf32, #tpu.memory_space<vmem>>, vector<8x1xf32>
      tpu.vector_store %arg5[%c0_17, %c0_18], %17 {strides = array<i32>} : memref<8x1xf32, #tpu.memory_space<vmem>>, vector<8x1xf32>,
    } else {
    }
    %c0 = arith.constant 0 : index
    %c0_1 = arith.constant 0 : index
    %3 = vector.load %arg4[%c0, %c0_1] : memref<8x1xf32, #tpu.memory_space<vmem>>, vector<8x1xf32>
    %c0_2 = arith.constant 0 : index
    %c0_3 = arith.constant 0 : index
    %4 = vector.load %arg2[%c0_2, %c0_3] : memref<8x256xf32, #tpu.memory_space<vmem>>, vector<8x256xf32>
    %cst = arith.constant dense<0.000000e+00> : vector<8xf32>
    %5 = vector.multi_reduction <add>, %4, %cst [1] : vector<8x256xf32> to vector<8xf32>
    %6 = vector.shape_cast %5 : vector<8xf32> to vector<8x1xf32>
    %7 = arith.addf %3, %6 : vector<8x1xf32>
    %c0_4 = arith.constant 0 : index
    %c0_5 = arith.constant 0 : index
    %8 = vector.load %arg4[%c0_4, %c0_5] : memref<8x1xf32, #tpu.memory_space<vmem>>, vector<8x1xf32>
    tpu.vector_store %arg4[%c0_4, %c0_5], %7 {strides = array<i32>} : memref<8x1xf32, #tpu.memory_space<vmem>>, vector<8x1xf32>,
    %c0_6 = arith.constant 0 : index
    %c0_7 = arith.constant 0 : index
    %9 = vector.load %arg5[%c0_6, %c0_7] : memref<8x1xf32, #tpu.memory_space<vmem>>, vector<8x1xf32>
    %c0_8 = arith.constant 0 : index
    %c0_9 = arith.constant 0 : index
    %10 = vector.load %arg3[%c0_8, %c0_9] : memref<8x256xf32, #tpu.memory_space<vmem>>, vector<8x256xf32>
    %cst_10 = arith.constant dense<0.000000e+00> : vector<8xf32>
    %11 = vector.multi_reduction <add>, %10, %cst_10 [1] : vector<8x256xf32> to vector<8xf32>
    %12 = vector.shape_cast %11 : vector<8xf32> to vector<8x1xf32>
    %13 = arith.addf %9, %12 : vector<8x1xf32>
    %c0_11 = arith.constant 0 : index
    %c0_12 = arith.constant 0 : index
    %14 = vector.load %arg5[%c0_11, %c0_12] : memref<8x1xf32, #tpu.memory_space<vmem>>, vector<8x1xf32>
    tpu.vector_store %arg5[%c0_11, %c0_12], %13 {strides = array<i32>} : memref<8x1xf32, #tpu.memory_space<vmem>>, vector<8x1xf32>,
    return
  }
  func.func @transform_0(%arg0: i32, %arg1: i32) -> (i32, i32) {
    %c0_i32 = arith.constant 0 : i32
    return %arg0, %arg1 : i32, i32
  }
  func.func @transform_1(%arg0: i32, %arg1: i32) -> (i32, i32) {
    %c0_i32 = arith.constant 0 : i32
    return %arg0, %arg1 : i32, i32
  }
  func.func @transform_2(%arg0: i32, %arg1: i32) -> (i32, i32) {
    %c0_i32 = arith.constant 0 : i32
    %c0_i32_0 = arith.constant 0 : i32
    return %arg0, %c0_i32 : i32, i32
  }
  func.func @transform_3(%arg0: i32, %arg1: i32) -> (i32, i32) {
    %c0_i32 = arith.constant 0 : i32
    %c0_i32_0 = arith.constant 0 : i32
    return %arg0, %c0_i32 : i32, i32
  }
}

</mosaic_0001>

<bundles_post_ra>
// kernel: tpu_custom_call.1
= control target key start
LH: loop header
LB: loop body
LE: loop exit
PB: predicated region body
PF: predicated region fallthrough
CT: control target
= control target key end

     0   :  { %9 = vsyncpa [#allocation3], 0  ;;  %s191_s0 = inlined_call_operand.hbm [shape: f32[8,256], index: 0, kind: input, shape index: {}]   ;;  %s192_s1 = inlined_call_operand.hbm [shape: f32[8,256], index: 1, kind: input, shape index: {}]   ;;  %s193_s2 = inlined_call_operand.vmem [shape: f32[8,1], index: 2, kind: output, shape index: {0}]   ;;  %s194_s3 = inlined_call_operand.vmem [shape: f32[8,1], index: 3, kind: output, shape index: {1}]  }
   0x1   :  { %10 = vsyncpa [#allocation5], 0  ;;  %s122_s12 = smov [#allocation2]   ;;  %s123_s14 = smov [#allocation4]  }
   0x2   :  { %s17_s13 = sshll.u32 %s122_s12, 4  ;;  %s27_s15 = sshll.u32 %s123_s14, 4  ;;  %s18_s13 = int_to_ptr.vmem [resolvable:$true] %s17_s13  ;;  %s28_s15 = int_to_ptr.vmem [resolvable:$true] %s27_s15 }
   0x3   :  { %s74_s18 = scalar_lea.hbm %s191_s0, 256 }
   0x4   :  { %p75_p0 = scmp.ne.s32.totalorder %s191_s0, %s74_s18  ;;  %p78_p1 = scmp.lt.u32.totalorder %s74_s18, %s191_s0 }
   0x6   :  { %p80_p2 = pnand %p78_p1, %p75_p0 }
   0x8   :  { %83 = shalt.err (!%p80_p2)
}
   0x9   :  { %s84_s23 = scalar_lea.vmem %s18_s13, 256  ;;  %p89_p4 = scmp.lt.s32.totalorder %s18_s13, %s18_s13 }
   0xa   :  { %p85_p3 = scmp.ne.s32.totalorder %s18_s13, %s84_s23  ;;  %p90_p5 = scmp.lt.s32.totalorder %s84_s23, %s84_s23 }
   0xc   :  { %p91_p6 = por %p90_p5, %p89_p4 }
   0xe   :  { %p92_p7 = pnand %p91_p6, %p85_p3 }
  0x10   :  { %95 = shalt.err (!%p92_p7)
}
  0x11   :  { %20 = dma.hbm_to_vmem [thread:$0]  %s191_s0, 256, %s18_s13, [#allocation3]  }
  0x12   :  { %s96_s28 = scalar_lea.hbm %s192_s1, 256 }
  0x13   :  { %p97_p8 = scmp.ne.s32.totalorder %s192_s1, %s96_s28  ;;  %p100_p9 = scmp.lt.u32.totalorder %s96_s28, %s192_s1 }
  0x15   :  { %p102_p10 = pnand %p100_p9, %p97_p8 }
  0x17   :  { %105 = shalt.err (!%p102_p10)
}
  0x18   :  { %s106_s6 = scalar_lea.vmem %s28_s15, 256  ;;  %p111_p12 = scmp.lt.s32.totalorder %s28_s15, %s28_s15 }
  0x19   :  { %p107_p11 = scmp.ne.s32.totalorder %s28_s15, %s106_s6  ;;  %p112_p13 = scmp.lt.s32.totalorder %s106_s6, %s106_s6 }
  0x1b   :  { %p113_p0 = por %p112_p13, %p111_p12 }
  0x1d   :  { %p114_p1 = pnand %p113_p0, %p107_p11 }
  0x1f   :  { %117 = shalt.err (!%p114_p1)
}
  0x20   :  { %30 = dma.hbm_to_vmem [thread:$0]  %s192_s1, 256, %s28_s15, [#allocation5]  }
  0x21   :  { %118 = dma.done.wait [#allocation3], 256  }
  0x22   :  { %119 = vsyncadd [#allocation3], 4294967040 }
  0x23   :  { %120 = dma.done.wait [#allocation5], 256  }
  0x24   :  { %121 = vsyncadd [#allocation5], 4294967040  ;;  %vm41_vm0 = vcmask 7168   ;;  %v124_v0 = vmov 0.0   ;;  %v45_v1 = vld [vmem:[#allocation2] sm:$0xff]  ;;  %v46_v2 = vld [vmem:[#allocation2 + $0x8] sm:$0xff] }
  0x25   :  { %42 = vst.msk [vmem:[%s193_s2] sm:$0xff] %vm41_vm0, %v124_v0  ;;  %43 = vst.msk [vmem:[%s194_s3] sm:$0xff] %vm41_vm0, %v124_v0  ;;  %v54_v3 = vld [vmem:[#allocation4] sm:$0xff]  ;;  %v47_v4 = vadd.f32 %v46_v2, %v45_v1  ;;  %v55_v5 = vld [vmem:[#allocation4 + $0x8] sm:$0xff] }
  0x26   :  { %v56_v6 = vadd.f32 %v55_v5, %v54_v3 }
  0x27   :  { %48 = vadd.xlane.f32.xlu0 %v47_v4 }
  0x2b   :  { %57 = vadd.xlane.f32.xlu0 %v56_v6 }
  0x2c   :  { %v44_v7 = vld [vmem:[%s193_s2] sm:$0xff] }
  0x2d   :  { %v53_v10 = vld [vmem:[%s194_s3] sm:$0xff] }
  0xb4   :  { %v49_v8 = vpop.xlane.xlu0 %48 }
  0xb5   :  { %v50_v9 = vadd.f32 %v49_v8, %v44_v7 }
  0xb7   :  { %52 = vst.msk [vmem:[%s193_s2] sm:$0xff] %vm41_vm0, %v50_v9 }
  0xb8   :  { %v58_v11 = vpop.xlane.xlu0 %57 }
  0xb9   :  { %v59_v12 = vadd.f32 %v58_v11, %v53_v10 }
  0xbb   :  { %60 = vst.msk [vmem:[%s194_s3] sm:$0xff] %vm41_vm0, %v59_v12 }
  0xbc   :  { %69 = vsyncpa [#allocation3], 1 }
  0xbd   :  { %70 = vsyncpa [#allocation5], 1 }

</bundles_post_ra>
